<compile_context>
chip_gen: v7x
topology: tpu7x:2x2x1
jax: 0.10.0
libtpu: 0.0.40
codegen_flags: <defaults>
</compile_context>

<pallas_src>
import functools

import jax
import jax.numpy as jnp
from jax.experimental import pallas as pl
from jax.experimental.pallas import tpu as pltpu


def _masked_ce_sum_kernel(x_ref, t_ref, m_ref, loss_out_ref, mask_out_ref,
                          acc_loss_ref, acc_mask_ref, *, rows):
    """Accumulate sum(CE(x_row, t_row) * mask_row) and sum(mask_row) per split."""
    c = pl.program_id(0)          # core-split axis ("parallel")
    i = pl.program_id(1)          # row-tile axis   ("arbitrary", reduction)
    n_inner = pl.num_programs(1)

    @pl.when(i == 0)
    def _init():
        acc_loss_ref[...] = jnp.zeros_like(acc_loss_ref)
        acc_mask_ref[...] = jnp.zeros_like(acc_mask_ref)

    x = x_ref[...].astype(jnp.float32)           # (tile_rows, C) logits
    t = t_ref[...]                               # (tile_rows, 1) int32 class ids
    m = m_ref[...].astype(jnp.float32)           # (tile_rows, 1) mask

    tr, num_classes = x.shape
    lane = jax.lax.broadcasted_iota(jnp.int32, (tr, num_classes), 1)

    # Per-row cross entropy: logsumexp(x) - x[target]
    row_max = jnp.max(x, axis=-1, keepdims=True)
    lse = jnp.log(jnp.sum(jnp.exp(x - row_max), axis=-1, keepdims=True)) + row_max
    picked = jnp.sum(jnp.where(lane == t, x, 0.0), axis=-1, keepdims=True)
    ce = lse - picked                            # (tile_rows, 1)

    # Mask out tail rows beyond `rows` (tail/clamped tiles may hold garbage;
    # the select guarantees those rows contribute exactly 0, even if ce is inf/nan).
    g = c * n_inner + i                          # logical (unclamped) tile index
    row_idx = g * tr + jax.lax.broadcasted_iota(jnp.int32, (tr, 1), 0)
    valid = row_idx < rows
    acc_loss_ref[...] += jnp.where(valid, ce * m, 0.0)   # cheap VPU adds per step
    acc_mask_ref[...] += jnp.where(valid, m, 0.0)

    @pl.when(i == n_inner - 1)
    def _finalize():
        loss_out_ref[...] = jnp.sum(acc_loss_ref[...]).reshape(1, 1)
        mask_out_ref[...] = jnp.sum(acc_mask_ref[...]).reshape(1, 1)


def transfo_cross_entropy_loss(inputs, target, loss_mask, *, dim_last=True,
                               target_block_bytes=4 * 1024 * 1024):
    """Pallas implementation of TransfoCrossEntropyLoss.forward.

    inputs:    (B, S, C) logits if dim_last else (B, C, S)
    target:    (B, S) int class indices
    loss_mask: (B, S) float mask
    Returns a scalar float32:  sum(CE * mask) / sum(mask).
    """
    if not dim_last:
        inputs = jnp.swapaxes(inputs, 1, 2)      # -> (B, S, C)
    B, S, C = inputs.shape
    rows = B * S

    x = inputs.reshape(rows, C)
    t = target.reshape(rows, 1).astype(jnp.int32)
    m = loss_mask.reshape(rows, 1).astype(jnp.float32)

    # ---- adaptive row tiling: ~target_block_bytes per logits block ----------
    itemsize = jnp.dtype(x.dtype).itemsize
    sub = 8 if itemsize >= 4 else (16 if itemsize == 2 else 32)  # sublane packing
    tile_rows = (target_block_bytes // max(1, C * itemsize)) // sub * sub
    tile_rows = max(sub, tile_rows)
    cap = (rows // sub) * sub if rows >= sub else sub            # never exceed array
    tile_rows = min(tile_rows, cap)

    # Tiny-rows corner case only (rows < sublane packing): pad up to one tile.
    if rows < tile_rows:
        pad = tile_rows - rows
        x = jnp.pad(x, ((0, pad), (0, 0)))
        t = jnp.pad(t, ((0, pad), (0, 0)))
        m = jnp.pad(m, ((0, pad), (0, 0)))
    rows_p = x.shape[0]

    tiles_total = -(-rows_p // tile_rows)
    num_splits = 2 if tiles_total >= 2 else 1      # v7x: 2 TensorCores
    tiles_per_split = -(-tiles_total // num_splits)

    def idx_map(ci, ii):
        # Clamp so a fully out-of-range logical tile (odd tile count) re-reads
        # the last valid tile; its rows are zeroed in-kernel by the row mask.
        g = jnp.minimum(ci * tiles_per_split + ii, tiles_total - 1)
        return (g, 0)

    block_bytes = tile_rows * C * itemsize
    vmem_limit = int(min(64 * 1024 * 1024,
                         max(32 * 1024 * 1024, 4 * block_bytes + (1 << 20))))

    out_block = pl.BlockSpec((1, 1), lambda ci, ii: (ci, 0))
    partial_loss, partial_mask = pl.pallas_call(
        functools.partial(_masked_ce_sum_kernel, rows=rows),
        out_shape=(jax.ShapeDtypeStruct((num_splits, 1), jnp.float32),
                   jax.ShapeDtypeStruct((num_splits, 1), jnp.float32)),
        grid_spec=pltpu.PrefetchScalarGridSpec(
            num_scalar_prefetch=0,
            grid=(num_splits, tiles_per_split),
            in_specs=[
                pl.BlockSpec((tile_rows, C), idx_map),   # logits (the big stream)
                pl.BlockSpec((tile_rows, 1), idx_map),   # targets
                pl.BlockSpec((tile_rows, 1), idx_map),   # mask
            ],
            out_specs=[out_block, out_block],
            scratch_shapes=[pltpu.VMEM((tile_rows, 1), jnp.float32),
                            pltpu.VMEM((tile_rows, 1), jnp.float32)],
        ),
        compiler_params=pltpu.CompilerParams(
            dimension_semantics=("parallel", "arbitrary"),
            vmem_limit_bytes=vmem_limit,
        ),
    )(x, t, m)

    sum_loss = jnp.sum(partial_loss)
    denom = jnp.sum(partial_mask)
    return (sum_loss / denom).astype(jnp.float32)


if __name__ == "__main__":
    key = jax.random.PRNGKey(0)
    k1, k2, k3 = jax.random.split(key, 3)

    B, S, C = 2, 8, 32                       # batch, seq, num_classes
    logits = jax.random.normal(k1, (B, S, C), dtype=jnp.float32)
    target = jax.random.randint(k2, (B, S), 0, C)
    loss_mask = (jax.random.uniform(k3, (B, S)) > 0.3).astype(jnp.float32)

    loss = jax.jit(transfo_cross_entropy_loss)(logits, target, loss_mask)
    loss = jax.block_until_ready(loss)

    # Reference check in plain JAX (matches nn.CrossEntropyLoss(reduction='none')).
    log_p = jax.nn.log_softmax(logits, axis=-1)
    ce = -jnp.take_along_axis(log_p, target[..., None], axis=-1)[..., 0]
    ref = jnp.sum(ce * loss_mask) / jnp.sum(loss_mask)
    assert jnp.allclose(loss, ref, rtol=1e-5, atol=1e-5), (loss, ref)

    print("KERNEL_OK")
</pallas_src>

<mosaic_0001>
module attributes {stable_mosaic.version = 11 : i64} {
  func.func @_masked_ce_sum_kernel(%arg0: i32, %arg1: i32, %arg2: memref<16x32xf32, #tpu.memory_space<vmem>>, %arg3: memref<16x1xi32, #tpu.memory_space<vmem>>, %arg4: memref<16x1xf32, #tpu.memory_space<vmem>>, %arg5: memref<1x1xf32, #tpu.memory_space<vmem>>, %arg6: memref<1x1xf32, #tpu.memory_space<vmem>>, %arg7: memref<16x1xf32, #tpu.memory_space<vmem>>, %arg8: memref<16x1xf32, #tpu.memory_space<vmem>>) attributes {dimension_semantics = [#tpu.dimension_semantics<parallel>, #tpu.dimension_semantics<arbitrary>], iteration_bounds = array<i64: 1, 1>, scalar_prefetch = 0 : i64, scratch_operands = 2 : i64, tpu.core_type = #tpu.core_type<tc>, window_params = [{transform_indices = @transform_0, window_bounds = array<i64: 16, 32>}, {transform_indices = @transform_1, window_bounds = array<i64: 16, 1>}, {transform_indices = @transform_2, window_bounds = array<i64: 16, 1>}, {transform_indices = @transform_3, window_bounds = array<i64: 1, 1>}, {transform_indices = @transform_4, window_bounds = array<i64: 1, 1>}]} {
    %c0_i32 = arith.constant 0 : i32
    %0 = arith.cmpi eq, %arg1, %c0_i32 : i32
    %1 = arith.extui %0 : i1 to i32
    %c0_i32_0 = arith.constant 0 : i32
    %2 = arith.cmpi ne, %1, %c0_i32_0 : i32
    scf.if %2 {
      %cst_22 = arith.constant 0.000000e+00 : f32
      %45 = vector.broadcast %cst_22 : f32 to vector<16x1xf32>
      %c0_23 = arith.constant 0 : index
      %c0_24 = arith.constant 0 : index
      %46 = vector.load %arg7[%c0_23, %c0_24] : memref<16x1xf32, #tpu.memory_space<vmem>>, vector<16x1xf32>
      tpu.vector_store %arg7[%c0_23, %c0_24], %45 {strides = array<i32>} : memref<16x1xf32, #tpu.memory_space<vmem>>, vector<16x1xf32>,
      %cst_25 = arith.constant 0.000000e+00 : f32
      %47 = vector.broadcast %cst_25 : f32 to vector<16x1xf32>
      %c0_26 = arith.constant 0 : index
      %c0_27 = arith.constant 0 : index
      %48 = vector.load %arg8[%c0_26, %c0_27] : memref<16x1xf32, #tpu.memory_space<vmem>>, vector<16x1xf32>
      tpu.vector_store %arg8[%c0_26, %c0_27], %47 {strides = array<i32>} : memref<16x1xf32, #tpu.memory_space<vmem>>, vector<16x1xf32>,
    } else {
    }
    %c0 = arith.constant 0 : index
    %c0_1 = arith.constant 0 : index
    %3 = vector.load %arg2[%c0, %c0_1] : memref<16x32xf32, #tpu.memory_space<vmem>>, vector<16x32xf32>
    %c0_2 = arith.constant 0 : index
    %c0_3 = arith.constant 0 : index
    %4 = vector.load %arg3[%c0_2, %c0_3] : memref<16x1xi32, #tpu.memory_space<vmem>>, vector<16x1xi32>
    %c0_4 = arith.constant 0 : index
    %c0_5 = arith.constant 0 : index
    %5 = vector.load %arg4[%c0_4, %c0_5] : memref<16x1xf32, #tpu.memory_space<vmem>>, vector<16x1xf32>
    %6 = tpu.iota {dimensions = array<i32: 1>} : vector<16x32xi32>
    %cst = arith.constant dense<0xFF800000> : vector<16xf32>
    %7 = vector.multi_reduction <maximumf>, %3, %cst [1] : vector<16x32xf32> to vector<16xf32>
    %8 = vector.shape_cast %7 : vector<16xf32> to vector<16x1xf32>
    %9 = vector.broadcast %8 : vector<16x1xf32> to vector<16x32xf32>
    %10 = arith.subf %3, %9 : vector<16x32xf32>
    %11 = math.exp %10 : vector<16x32xf32>
    %cst_6 = arith.constant dense<0.000000e+00> : vector<16xf32>
    %12 = vector.multi_reduction <add>, %11, %cst_6 [1] : vector<16x32xf32> to vector<16xf32>
    %13 = vector.shape_cast %12 : vector<16xf32> to vector<16x1xf32>
    %14 = math.log %13 : vector<16x1xf32>
    %15 = arith.addf %14, %8 : vector<16x1xf32>
    %16 = vector.broadcast %4 : vector<16x1xi32> to vector<16x32xi32>
    %17 = arith.cmpi eq, %6, %16 : vector<16x32xi32>
    %cst_7 = arith.constant 0.000000e+00 : f32
    %18 = vector.broadcast %cst_7 : f32 to vector<16x32xf32>
    %19 = arith.select %17, %3, %18 : vector<16x32xi1>, vector<16x32xf32>
    %cst_8 = arith.constant dense<0.000000e+00> : vector<16xf32>
    %20 = vector.multi_reduction <add>, %19, %cst_8 [1] : vector<16x32xf32> to vector<16xf32>
    %21 = vector.shape_cast %20 : vector<16xf32> to vector<16x1xf32>
    %22 = arith.subf %15, %21 : vector<16x1xf32>
    %c1_i32 = arith.constant 1 : i32
    %23 = arith.muli %arg0, %c1_i32 : i32
    %24 = arith.addi %23, %arg1 : i32
    %c16_i32 = arith.constant 16 : i32
    %25 = arith.muli %24, %c16_i32 : i32
    %26 = tpu.iota {dimensions = array<i32: 0>} : vector<16x1xi32>
    %27 = vector.broadcast %25 : i32 to vector<16x1xi32>
    %28 = arith.addi %27, %26 : vector<16x1xi32>
    %c16_i32_9 = arith.constant 16 : i32
    %29 = vector.broadcast %c16_i32_9 : i32 to vector<16x1xi32>
    %30 = arith.cmpi slt, %28, %29 : vector<16x1xi32>
    %c0_10 = arith.constant 0 : index
    %c0_11 = arith.constant 0 : index
    %31 = vector.load %arg7[%c0_10, %c0_11] : memref<16x1xf32, #tpu.memory_space<vmem>>, vector<16x1xf32>
    %32 = arith.mulf %22, %5 : vector<16x1xf32>
    %cst_12 = arith.constant 0.000000e+00 : f32
    %33 = vector.broadcast %cst_12 : f32 to vector<16x1xf32>
    %34 = arith.select %30, %32, %33 : vector<16x1xi1>, vector<16x1xf32>
    %35 = arith.addf %31, %34 : vector<16x1xf32>
    %c0_13 = arith.constant 0 : index
    %c0_14 = arith.constant 0 : index
    %36 = vector.load %arg7[%c0_13, %c0_14] : memref<16x1xf32, #tpu.memory_space<vmem>>, vector<16x1xf32>
    tpu.vector_store %arg7[%c0_13, %c0_14], %35 {strides = array<i32>} : memref<16x1xf32, #tpu.memory_space<vmem>>, vector<16x1xf32>,
    %c0_15 = arith.constant 0 : index
    %c0_16 = arith.constant 0 : index
    %37 = vector.load %arg8[%c0_15, %c0_16] : memref<16x1xf32, #tpu.memory_space<vmem>>, vector<16x1xf32>
    %cst_17 = arith.constant 0.000000e+00 : f32
    %38 = vector.broadcast %cst_17 : f32 to vector<16x1xf32>
    %39 = arith.select %30, %5, %38 : vector<16x1xi1>, vector<16x1xf32>
    %40 = arith.addf %37, %39 : vector<16x1xf32>
    %c0_18 = arith.constant 0 : index
    %c0_19 = arith.constant 0 : index
    %41 = vector.load %arg8[%c0_18, %c0_19] : memref<16x1xf32, #tpu.memory_space<vmem>>, vector<16x1xf32>
    tpu.vector_store %arg8[%c0_18, %c0_19], %40 {strides = array<i32>} : memref<16x1xf32, #tpu.memory_space<vmem>>, vector<16x1xf32>,
    %c0_i32_20 = arith.constant 0 : i32
    %42 = arith.cmpi eq, %arg1, %c0_i32_20 : i32
    %43 = arith.extui %42 : i1 to i32
    %c0_i32_21 = arith.constant 0 : i32
    %44 = arith.cmpi ne, %43, %c0_i32_21 : i32
    scf.if %44 {
      %c0_22 = arith.constant 0 : index
      %c0_23 = arith.constant 0 : index
      %45 = vector.load %arg7[%c0_22, %c0_23] : memref<16x1xf32, #tpu.memory_space<vmem>>, vector<16x1xf32>
      %46 = vector.shape_cast %45 : vector<16x1xf32> to vector<1x16x1xf32>
      %cst_24 = arith.constant dense<0.000000e+00> : vector<1xf32>
      %47 = vector.multi_reduction <add>, %46, %cst_24 [1, 2] : vector<1x16x1xf32> to vector<1xf32>
      %48 = vector.shape_cast %47 : vector<1xf32> to vector<1x1x1xf32>
      %49 = vector.extract %48[0, 0, 0] : f32 from vector<1x1x1xf32>
      %50 = vector.broadcast %49 : f32 to vector<1x1xf32>
      %c0_25 = arith.constant 0 : index
      %c0_26 = arith.constant 0 : index
      %51 = vector.load %arg5[%c0_25, %c0_26] : memref<1x1xf32, #tpu.memory_space<vmem>>, vector<1x1xf32>
      tpu.vector_store %arg5[%c0_25, %c0_26], %50 {strides = array<i32>} : memref<1x1xf32, #tpu.memory_space<vmem>>, vector<1x1xf32>,
      %c0_27 = arith.constant 0 : index
      %c0_28 = arith.constant 0 : index
      %52 = vector.load %arg8[%c0_27, %c0_28] : memref<16x1xf32, #tpu.memory_space<vmem>>, vector<16x1xf32>
      %53 = vector.shape_cast %52 : vector<16x1xf32> to vector<1x16x1xf32>
      %cst_29 = arith.constant dense<0.000000e+00> : vector<1xf32>
      %54 = vector.multi_reduction <add>, %53, %cst_29 [1, 2] : vector<1x16x1xf32> to vector<1xf32>
      %55 = vector.shape_cast %54 : vector<1xf32> to vector<1x1x1xf32>
      %56 = vector.extract %55[0, 0, 0] : f32 from vector<1x1x1xf32>
      %57 = vector.broadcast %56 : f32 to vector<1x1xf32>
      %c0_30 = arith.constant 0 : index
      %c0_31 = arith.constant 0 : index
      %58 = vector.load %arg6[%c0_30, %c0_31] : memref<1x1xf32, #tpu.memory_space<vmem>>, vector<1x1xf32>
      tpu.vector_store %arg6[%c0_30, %c0_31], %57 {strides = array<i32>} : memref<1x1xf32, #tpu.memory_space<vmem>>, vector<1x1xf32>,
    } else {
    }
    return
  }
  func.func @transform_0(%arg0: i32, %arg1: i32) -> (i32, i32) {
    %c1_i32 = arith.constant 1 : i32
    %0 = arith.muli %arg0, %c1_i32 : i32
    %1 = arith.addi %0, %arg1 : i32
    %c0_i32 = arith.constant 0 : i32
    %2 = arith.minsi %1, %c0_i32 : i32
    %c0_i32_0 = arith.constant 0 : i32
    %c0_i32_1 = arith.constant 0 : i32
    return %2, %c0_i32_0 : i32, i32
  }
  func.func @transform_1(%arg0: i32, %arg1: i32) -> (i32, i32) {
    %c1_i32 = arith.constant 1 : i32
    %0 = arith.muli %arg0, %c1_i32 : i32
    %1 = arith.addi %0, %arg1 : i32
    %c0_i32 = arith.constant 0 : i32
    %2 = arith.minsi %1, %c0_i32 : i32
    %c0_i32_0 = arith.constant 0 : i32
    %c0_i32_1 = arith.constant 0 : i32
    return %2, %c0_i32_0 : i32, i32
  }
  func.func @transform_2(%arg0: i32, %arg1: i32) -> (i32, i32) {
    %c1_i32 = arith.constant 1 : i32
    %0 = arith.muli %arg0, %c1_i32 : i32
    %1 = arith.addi %0, %arg1 : i32
    %c0_i32 = arith.constant 0 : i32
    %2 = arith.minsi %1, %c0_i32 : i32
    %c0_i32_0 = arith.constant 0 : i32
    %c0_i32_1 = arith.constant 0 : i32
    return %2, %c0_i32_0 : i32, i32
  }
  func.func @transform_3(%arg0: i32, %arg1: i32) -> (i32, i32) {
    %c0_i32 = arith.constant 0 : i32
    %c0_i32_0 = arith.constant 0 : i32
    return %arg0, %c0_i32 : i32, i32
  }
  func.func @transform_4(%arg0: i32, %arg1: i32) -> (i32, i32) {
    %c0_i32 = arith.constant 0 : i32
    %c0_i32_0 = arith.constant 0 : i32
    return %arg0, %c0_i32 : i32, i32
  }
}

</mosaic_0001>

<bundles_post_ra>
// kernel: transfo_cross_entropy_loss.1
= control target key start
LH: loop header
LB: loop body
LE: loop exit
PB: predicated region body
PF: predicated region fallthrough
CT: control target
= control target key end

     0   :  { %10 = vsyncpa [#allocation5], 0  ;;  %vm131_vm0 = vcmask 261120   ;;  %v351_v4 = vmov 0   ;;  %s442_s0 = inlined_call_operand.vmem [shape: f32[16,32], index: 0, kind: input, shape index: {}]   ;;  %s443_s1 = inlined_call_operand.vmem [shape: s32[16,1], index: 1, kind: input, shape index: {}]   ;;  %s444_s2 = inlined_call_operand.vmem [shape: f32[16,1], index: 2, kind: input, shape index: {}]   ;;  %s445_s3 = inlined_call_operand.hbm [shape: f32[1,1], index: 3, kind: output, shape index: {0}]   ;;  %s446_s4 = inlined_call_operand.hbm [shape: f32[1,1], index: 4, kind: output, shape index: {1}]  }
   0x1   :  { %v123_v0 = vld [vmem:[%s442_s0] sm:$0xff]  ;;  %v124_v1 = vld [vmem:[%s442_s0 + $0x8] sm:$0xff]  ;;  %293 = vset.pattern.permute.xlu1 %v351_v4  ;;  %294 = vset.pattern.permute.xlu0 %v351_v4 }
   0x2   :  { %v125_v2 = vld [vmem:[%s443_s1] sm:$0xff]  ;;  %v132_v3 = vsel %vm131_vm0, %v123_v0, -inf }
   0x3   :  { %11 = vsyncpa [#allocation7], 0  ;;  %133 = vmax.xlane.f32.xlu0 %v132_v3  ;;  %157 = vperm.xlu1 %293, %v125_v2   ;;  %v135_v5 = vsel %vm131_vm0, %v124_v1, -inf  ;;  %v126_v6 = vld [vmem:[%s443_s1 + $0x8] sm:$0xff]  ;;  %v129_v11 = vlaneseq  ;;  %vm118_vm3 = vcmask 7168   ;;  %v352_v25 = vmov 0.0  }
   0x4   :  { %119 = vst.msk [vmem:[#allocation2] sm:$0xff] %vm118_vm3, %v352_v25  ;;  %121 = vst.msk [vmem:[#allocation3] sm:$0xff] %vm118_vm3, %v352_v25  ;;  %v127_v26 = vld [vmem:[%s444_s2] sm:$0xff]  ;;  %v128_v29 = vld [vmem:[%s444_s2 + $0x8] sm:$0xff]  ;;  %s353_s2 = smov [#allocation4]   ;;  %vm221_vm4 = vcmask 0  }
   0x5   :  { %v130_v15 = vand.u32 127, %v129_v11  ;;  %120 = vst.msk [vmem:[#allocation2 + $0x8] sm:$0xff] %vm118_vm3, %v352_v25  ;;  %122 = vst.msk [vmem:[#allocation3 + $0x8] sm:$0xff] %vm118_vm3, %v352_v25  ;;  %s245_s25 = sshll.u32 %s353_s2, 4  ;;  %s354_s27 = smov [#allocation6]   ;;  %s246_s25 = int_to_ptr.vmem [resolvable:$true] %s245_s25 }
   0x6   :  { %s255_s28 = sshll.u32 %s354_s27, 4  ;;  %s303_s29 = scalar_lea.vmem %s246_s25, 16  ;;  %s256_s28 = int_to_ptr.vmem [resolvable:$true] %s255_s28 }
   0x7   :  { %136 = vmax.xlane.f32.xlu0 %v135_v5  ;;  %160 = vperm.xlu1 %293, %v126_v6   ;;  %p304_p0 = scmp.ne.s32.totalorder %s246_s25, %s303_s29  ;;  %s307_s30 = scalar_lea.vmem %s246_s25, 32 }
   0x8   :  { %p308_p1 = scmp.lt.s32.totalorder %s246_s25, %s246_s25  ;;  %p309_p2 = scmp.lt.s32.totalorder %s307_s30, %s303_s29 }
   0xa   :  { %p310_p3 = por %p309_p2, %p308_p1 }
   0xb   :  { %v195_v27 = vld [vmem:[#allocation3] sm:$0xff]  ;;  %v184_v41 = vld [vmem:[#allocation2] sm:$0xff] }
   0xc   :  { %v199_v28 = vadd.f32 %v195_v27, %v127_v26  ;;  %v196_v30 = vld [vmem:[#allocation3 + $0x8] sm:$0xff]  ;;  %v185_v47 = vld [vmem:[#allocation2 + $0x8] sm:$0xff]  ;;  %p311_p4 = pnand %p310_p3, %p304_p0 }
   0xd   :  { %v200_v31 = vadd.f32 %v196_v30, %v128_v29 }
   0xe   :  { %201 = vst.msk [vmem:[#allocation3] sm:$0xff] %vm118_vm3, %v199_v28 }
   0xf   :  { %202 = vst.msk [vmem:[#allocation3 + $0x8] sm:$0xff] %vm118_vm3, %v200_v31 }
  0x15   :  { %v223_v51 = vld [vmem:[#allocation3] sm:$0xff] }
  0x16   :  { %v224_v52 = vld [vmem:[#allocation3 + $0x8] sm:$0xff]  ;;  %v225_v56 = vsel %vm118_vm3, %v223_v51, 0.0 }
  0x17   :  { %v226_v57 = vsel %vm118_vm3, %v224_v52, 0.0 }
  0x18   :  { %v227_v59 = vadd.f32 %v226_v57, %v225_v56 }
  0x82   :  { %v158_v14 = vpop.permute.xlu1 %157 }
  0x83   :  { %vm162_vm1 = vcmp.eq.s32.totalorder %v130_v15, %v158_v14 }
  0x84   :  { %v164_v18 = vsel %vm162_vm1, %v123_v0, 0.0 }
  0x85   :  { %v166_v20 = vsel %vm131_vm0, %v164_v18, 0.0 }
  0x86   :  { %v161_v16 = vpop.permute.xlu1 %160 }
  0x87   :  { %vm163_vm2 = vcmp.eq.s32.totalorder %v130_v15, %v161_v16 }
  0x88   :  { %v165_v22 = vsel %vm163_vm2, %v124_v1, 0.0 }
  0x89   :  { %v169_v24 = vsel %vm131_vm0, %v165_v22, 0.0 }
  0x90   :  { %v134_v7 = vpop.xlane.xlu0 %133 }
  0x91   :  { %v138_v8 = vsub.f32 %v123_v0, %v134_v7 }
  0x93   :  { %v140_v9 = vmul.f32 1.442695, %v138_v8 }
  0x94   :  { %v137_v10 = vpop.xlane.xlu0 %136 }
  0x95   :  { %295 = vpow2.f32 %v140_v9  ;;  %v139_v12 = vsub.f32 %v124_v1, %v137_v10 }
  0x97   :  { %v142_v13 = vmul.f32 1.442695, %v139_v12 }
  0x99   :  { %297 = vpow2.f32 %v142_v13 }
  0x9f   :  { %v296_v17 = vpop.eup %295 }
  0xa0   :  { %v144_v19 = vsel %vm131_vm0, %v296_v17, 0.0 }
  0xa1   :  { %145 = vadd.xlane.f32.xlu0 %v144_v19 }
  0xa3   :  { %v298_v21 = vpop.eup %297 }
  0xa4   :  { %v147_v23 = vsel %vm131_vm0, %v298_v21, 0.0 }
  0xa5   :  { %148 = vadd.xlane.f32.xlu1 %v147_v23  ;;  %167 = vadd.xlane.f32.xlu0 %v166_v20 }
  0xa9   :  { %170 = vadd.xlane.f32.xlu0 %v169_v24 }
 0x12e   :  { %v146_v32 = vpop.xlane.xlu0 %145 }
 0x12f   :  { %299 = vlog2.f32 %v146_v32 }
 0x132   :  { %v149_v33 = vpop.xlane.xlu1 %148  ;;  %v168_v36 = vpop.xlane.xlu0 %167 }
 0x133   :  { %301 = vlog2.f32 %v149_v33 }
 0x136   :  { %v171_v44 = vpop.xlane.xlu0 %170 }
 0x139   :  { %v300_v34 = vpop.eup %299 }
 0x13a   :  { %v151_v35 = vmul.f32 0.6931472, %v300_v34 }
 0x13c   :  { %v154_v37 = vadd.f32 %v151_v35, %v134_v7 }
 0x13d   :  { %v302_v38 = vpop.eup %301 }
 0x13e   :  { %v153_v39 = vmul.f32 0.6931472, %v302_v38  ;;  %v172_v40 = vsub.f32 %v154_v37, %v168_v36 }
 0x140   :  { %v186_v42 = vmul.f32 %v172_v40, %v127_v26  ;;  %v155_v43 = vadd.f32 %v153_v39, %v137_v10 }
 0x142   :  { %v190_v45 = vadd.f32 %v186_v42, %v184_v41  ;;  %v173_v46 = vsub.f32 %v155_v43, %v171_v44 }
 0x144   :  { %193 = vst.msk [vmem:[#allocation2] sm:$0xff] %vm118_vm3, %v190_v45  ;;  %v187_v48 = vmul.f32 %v173_v46, %v128_v29 }
 0x146   :  { %v191_v49 = vadd.f32 %v187_v48, %v185_v47 }
 0x148   :  { %194 = vst.msk [vmem:[#allocation2 + $0x8] sm:$0xff] %vm118_vm3, %v191_v49 }
 0x14b   :  { %v206_v50 = vld [vmem:[#allocation2] sm:$0xff] }
 0x14c   :  { %v208_v54 = vsel %vm118_vm3, %v206_v50, 0.0 }
 0x14f   :  { %v207_v53 = vld [vmem:[#allocation2 + $0x8] sm:$0xff] }
 0x150   :  { %v209_v55 = vsel %vm118_vm3, %v207_v53, 0.0 }
 0x151   :  { %v210_v58 = vadd.f32 %v209_v55, %v208_v54 }
 0x153   :  { %211 = vadd.xlane.f32.xlu0 %v210_v58 }
 0x157   :  { %228 = vadd.xlane.f32.xlu0 %v227_v59 }
 0x1e0   :  { %v212_v60 = vpop.xlane.xlu0 %211 }
 0x1e1   :  { %v213_v61 = vrot.slane %v212_v60, 4 }
 0x1e3   :  { %v214_v62 = vadd.f32 %v213_v61, %v212_v60 }
 0x1e4   :  { %v229_v63 = vpop.xlane.xlu0 %228 }
 0x1e5   :  { %v215_v0 = vrot.slane %v214_v62, 2  ;;  %v230_v1 = vrot.slane %v229_v63, 4 }
 0x1e7   :  { %v231_v2 = vadd.f32 %v230_v1, %v229_v63  ;;  %v216_v3 = vadd.f32 %v215_v0, %v214_v62 }
 0x1e9   :  { %v232_v4 = vrot.slane %v231_v2, 2  ;;  %v217_v5 = vrot.slane %v216_v3, 1 }
 0x1eb   :  { %v233_v6 = vadd.f32 %v232_v4, %v231_v2  ;;  %v218_v7 = vadd.f32 %v217_v5, %v216_v3 }
 0x1ed   :  { %285 = vpush %v218_v7  ;;  %v234_v8 = vrot.slane %v233_v6, 1 }
 0x1ef   :  { %v235_v9 = vadd.f32 %v234_v8, %v233_v6 }
 0x1f1   :  { %287 = vpush %v235_v9 }
 0x21e   :  { %s286_s26 = spop %285 }
 0x21f   :  { %v220_v10 = vstv %s286_s26 }
 0x220   :  { %222 = vst.msk [vmem:[#allocation4] sm:$0x1] %vm221_vm4, %v220_v10 }
 0x221   :  { %314 = shalt.err (!%p311_p4)
}
 0x222   :  { %s315_s7 = scalar_lea.hbm %s445_s3, 16 }
 0x223   :  { %p316_p5 = scmp.ne.s32.totalorder %s445_s3, %s315_s7  ;;  %p319_p6 = scmp.lt.u32.totalorder %s315_s7, %s445_s3 }
 0x225   :  { %p321_p7 = pnand %p319_p6, %p316_p5 }
 0x227   :  { %324 = shalt.err (!%p321_p7)
}
 0x228   :  { %248 = dma.vmem_to_hbm [thread:$0]  %s246_s25, 16, %s445_s3, [#allocation5]  }
 0x229   :  { %s288_s14 = spop %287  ;;  %s325_s15 = scalar_lea.vmem %s256_s28, 16 }
 0x22a   :  { %v237_v11 = vstv %s288_s14  ;;  %p326_p8 = scmp.ne.s32.totalorder %s256_s28, %s325_s15  ;;  %s329_s16 = scalar_lea.vmem %s256_s28, 32 }
 0x22b   :  { %238 = vst.msk [vmem:[#allocation6] sm:$0x1] %vm221_vm4, %v237_v11  ;;  %p330_p9 = scmp.lt.s32.totalorder %s256_s28, %s256_s28  ;;  %p331_p10 = scmp.lt.s32.totalorder %s329_s16, %s325_s15 }
 0x22d   :  { %p332_p11 = por %p331_p10, %p330_p9 }
 0x22f   :  { %p333_p12 = pnand %p332_p11, %p326_p8 }
 0x231   :  { %336 = shalt.err (!%p333_p12)
}
 0x232   :  { %s337_s19 = scalar_lea.hbm %s446_s4, 16 }
 0x233   :  { %p338_p13 = scmp.ne.s32.totalorder %s446_s4, %s337_s19  ;;  %p341_p0 = scmp.lt.u32.totalorder %s337_s19, %s446_s4 }
 0x235   :  { %p343_p1 = pnand %p341_p0, %p338_p13 }
 0x237   :  { %346 = shalt.err (!%p343_p1)
}
 0x238   :  { %258 = dma.vmem_to_hbm [thread:$0]  %s256_s28, 16, %s446_s4, [#allocation7]  }
 0x239   :  { %347 = dma.done.wait [#allocation5], 16  }
 0x23a   :  { %348 = vsyncadd [#allocation5], 4294967280 }
 0x23b   :  { %349 = dma.done.wait [#allocation7], 16  }
 0x23c   :  { %350 = vsyncadd [#allocation7], 4294967280 }
 0x23d   :  { %265 = vsyncpa [#allocation5], 1 }
 0x23e   :  { %266 = vsyncpa [#allocation7], 1 }

</bundles_post_ra>
